<compile_context>
chip_gen: v6e
topology: v6e:2x2x1
jax: 0.10.0
libtpu: 0.0.40
codegen_flags: <defaults>
</compile_context>

<pallas_src>
import jax
import jax.numpy as jnp
from jax.experimental import pallas as pl
from jax.experimental.pallas import tpu as pltpu


def _cdiv(a, b):
    return -(-a // b)


# --------------------------------------------------------------------------- #
# Stage 1: fused ResBlock stack (computed once per head, not per vocab tile)  #
# --------------------------------------------------------------------------- #
def _resblock_kernel(x_ref, w_ref, b_ref, xpost_ref, xcur_ref):
    # x_ref:     (B, H)        f32   original hidden states (resident)
    # w_ref:     (1, 1, H, H)  bf16  one ResBlock weight (head h, layer l)
    # b_ref:     (1, 1, 1, H)  f32   one ResBlock bias
    # xpost_ref: (1, B, H)     f32   post-ResBlock activations for head h
    # xcur_ref:  (B, H)        f32   persistent scratch carrying x across layers
    l = pl.program_id(1)

    @pl.when(l == 0)  # fires per head (and per core on megacore), not just once
    def _():
        xcur_ref[...] = x_ref[...]

    x = xcur_ref[...]
    pre = (
        jnp.dot(x.astype(jnp.bfloat16), w_ref[0, 0],
                preferred_element_type=jnp.float32)
        + b_ref[0, 0]
    )
    x = x + pre * jax.nn.sigmoid(pre)  # SiLU(pre) = pre * sigmoid(pre)
    xcur_ref[...] = x

    @pl.when(l == pl.num_programs(1) - 1)
    def _():
        xpost_ref[0] = x


# --------------------------------------------------------------------------- #
# Stage 2: streaming lm-head, all heads fused, tiled over the vocab axis      #
# --------------------------------------------------------------------------- #
def _lm_head_kernel(x_ref, w_ref, out_ref):
    # x_ref:   (1, B, H)   f32   post-ResBlock activations for head h
    # w_ref:   (1, H, TV)  bf16  vocab tile of the final projection (no bias)
    # out_ref: (1, B, TV)  f32   vocab tile of the logits
    out_ref[0] = jnp.dot(
        x_ref[0].astype(jnp.bfloat16), w_ref[0],
        preferred_element_type=jnp.float32,
    )


def medusa_head_forward(hidden_states, params, *, vocab_tile=1024):
    """hidden_states: (B, H) float32.
    params: dict of stacked per-head parameters:
        'w_stack' : (NH, L, H, H)  ResBlock weights, (in, out) layout
        'b_stack' : (NH, L, 1, H)  ResBlock biases
        'w_out'   : (NH, H, V)     final projections, (in, out) layout, no bias
    Returns: list of (B, V) float32 logits, one per head (matches PyTorch forward).
    """
    B, H = hidden_states.shape
    w_stack = params["w_stack"].astype(jnp.bfloat16)
    b_stack = params["b_stack"].astype(jnp.float32)
    w_out = params["w_out"].astype(jnp.bfloat16)
    NH, L = w_stack.shape[0], w_stack.shape[1]
    V = w_out.shape[-1]

    # ---- Stage 1: ResBlock stack once per head -------------------------------
    x_post = pl.pallas_call(
        _resblock_kernel,
        out_shape=jax.ShapeDtypeStruct((NH, B, H), jnp.float32),
        grid_spec=pltpu.PrefetchScalarGridSpec(
            num_scalar_prefetch=0,
            grid=(NH, L),
            in_specs=[
                pl.BlockSpec((B, H), lambda h, l: (0, 0)),
                pl.BlockSpec((1, 1, H, H), lambda h, l: (h, l, 0, 0)),
                pl.BlockSpec((1, 1, 1, H), lambda h, l: (h, l, 0, 0)),
            ],
            out_specs=pl.BlockSpec((1, B, H), lambda h, l: (h, 0, 0)),
            scratch_shapes=[pltpu.VMEM((B, H), jnp.float32)],
        ),
        compiler_params=pltpu.CompilerParams(
            dimension_semantics=("parallel", "arbitrary"),
        ),
    )(hidden_states.astype(jnp.float32), w_stack, b_stack)

    # ---- Stage 2: vocab-tiled, head-fused lm-head -----------------------------
    # Large, lane-dense vocab tile (multiple of 128); pad V up to a tile multiple.
    tv = int(min(vocab_tile, _cdiv(V, 128) * 128))
    Vp = int(_cdiv(V, tv) * tv)
    if Vp != V:
        w_out = jnp.pad(w_out, ((0, 0), (0, 0), (0, Vp - V)))

    # VMEM budget: double-buffered bf16 w_out tile + f32 x/out blocks + slack,
    # clamped to stay within v7x's 64 MiB per-TC VMEM.
    vmem_limit = int(
        min(
            64 * 1024 * 1024,
            max(
                32 * 1024 * 1024,
                2 * (H * tv * 2 + B * tv * 4 + B * H * 4) + (4 << 20),
            ),
        )
    )
    cost = pl.CostEstimate(
        flops=2 * NH * B * H * Vp,
        transcendentals=0,
        bytes_accessed=NH * H * Vp * 2 + NH * B * Vp * 4 + NH * B * H * 4,
    )

    logits = pl.pallas_call(
        _lm_head_kernel,
        out_shape=jax.ShapeDtypeStruct((NH, B, Vp), jnp.float32),
        grid_spec=pltpu.PrefetchScalarGridSpec(
            num_scalar_prefetch=0,
            grid=(NH, Vp // tv),
            in_specs=[
                pl.BlockSpec((1, B, H), lambda h, j: (h, 0, 0)),
                pl.BlockSpec((1, H, tv), lambda h, j: (h, 0, j)),
            ],
            out_specs=pl.BlockSpec((1, B, tv), lambda h, j: (h, 0, j)),
        ),
        compiler_params=pltpu.CompilerParams(
            dimension_semantics=("parallel", "parallel"),
            vmem_limit_bytes=vmem_limit,
        ),
        cost_estimate=cost,
    )(x_post, w_out)

    if Vp != V:
        logits = logits[..., :V]
    return [logits[h] for h in range(NH)]


# --------------------------------------------------------------------------- #
# Parameters & reference                                                       #
# --------------------------------------------------------------------------- #
def init_medusa_params(key, hidden_size, vocab_size, medusa_num_heads,
                       medusa_num_layers, nonzero_resblock_weights=False):
    """Parameter init matching the PyTorch module's __init__ when
    nonzero_resblock_weights=False (ResBlock weights zero-initialized,
    torch.nn.init.zeros_).  Set nonzero_resblock_weights=True in tests so the
    fused x @ W_l MXU path is numerically exercised."""
    bound = 1.0 / float(hidden_size) ** 0.5
    k_w, k_b, k_o = jax.random.split(key, 3)
    shape_w = (medusa_num_heads, medusa_num_layers, hidden_size, hidden_size)
    if nonzero_resblock_weights:
        w_stack = jax.random.uniform(k_w, shape_w, jnp.float32, -bound, bound)
    else:
        w_stack = jnp.zeros(shape_w, jnp.float32)
    b_stack = jax.random.uniform(
        k_b, (medusa_num_heads, medusa_num_layers, 1, hidden_size),
        jnp.float32, -bound, bound)
    # (in, out) layout == transpose of PyTorch's (out, in) weight.
    w_out = jax.random.uniform(
        k_o, (medusa_num_heads, hidden_size, vocab_size),
        jnp.float32, -bound, bound)
    return {"w_stack": w_stack, "b_stack": b_stack, "w_out": w_out}


def _reference_forward(hidden_states, params):
    """Pure-JAX reference mirroring the PyTorch forward (with the same bf16
    weight rounding the kernel uses, f32 accumulation)."""
    w_stack = params["w_stack"].astype(jnp.bfloat16)
    b_stack = params["b_stack"].astype(jnp.float32)
    w_out = params["w_out"].astype(jnp.bfloat16)
    NH, L = w_stack.shape[0], w_stack.shape[1]
    outs = []
    for h in range(NH):
        x = hidden_states.astype(jnp.float32)
        for l in range(L):
            pre = jnp.dot(x.astype(jnp.bfloat16), w_stack[h, l],
                          preferred_element_type=jnp.float32) + b_stack[h, l]
            x = x + pre * jax.nn.sigmoid(pre)
        outs.append(jnp.dot(x.astype(jnp.bfloat16), w_out[h],
                            preferred_element_type=jnp.float32))
    return outs


if __name__ == "__main__":
    batch = 8
    hidden_size = 128
    vocab_size = 500          # deliberately NOT a multiple of 128 -> exercises vocab padding
    medusa_num_heads = 2
    medusa_num_layers = 2

    key = jax.random.PRNGKey(0)
    key, kx = jax.random.split(key)
    hidden_states = jax.random.normal(kx, (batch, hidden_size), jnp.float32)

    # Use non-zero ResBlock weights so the fused ResBlock matmul + (in,out)
    # transpose convention are actually validated (the PyTorch module zero-inits
    # them; pass nonzero_resblock_weights=False to reproduce that exactly).
    params = init_medusa_params(
        key, hidden_size, vocab_size, medusa_num_heads, medusa_num_layers,
        nonzero_resblock_weights=True,
    )

    logits_list = medusa_head_forward(hidden_states, params)
    logits_list = [jax.block_until_ready(l) for l in logits_list]

    ref_list = _reference_forward(hidden_states, params)
    for got, ref in zip(logits_list, ref_list):
        assert got.shape == (batch, vocab_size)
        max_err = float(jnp.max(jnp.abs(got - ref)))
        assert jnp.allclose(got, ref, atol=5e-3, rtol=5e-3), (
            f"mismatch vs reference (max abs err {max_err})"
        )

    print("KERNEL_OK")
</pallas_src>

<mosaic_0001>
module attributes {stable_mosaic.version = 11 : i64} {
  func.func @_resblock_kernel(%arg0: i32, %arg1: i32, %arg2: memref<8x128xf32, #tpu.memory_space<vmem>>, %arg3: memref<1x1x128x128xbf16, #tpu.memory_space<vmem>>, %arg4: memref<1x1x1x128xf32, #tpu.memory_space<vmem>>, %arg5: memref<1x8x128xf32, #tpu.memory_space<vmem>>, %arg6: memref<8x128xf32, #tpu.memory_space<vmem>>) attributes {dimension_semantics = [#tpu.dimension_semantics<parallel>, #tpu.dimension_semantics<arbitrary>], iteration_bounds = array<i64: 2, 2>, scalar_prefetch = 0 : i64, scratch_operands = 1 : i64, tpu.core_type = #tpu.core_type<tc>, window_params = [{pipeline_mode = #tpu.pipeline_mode<synchronous>, transform_indices = @transform_0, window_bounds = array<i64: 8, 128>}, {transform_indices = @transform_1, window_bounds = array<i64: 1, 1, 128, 128>}, {transform_indices = @transform_2, window_bounds = array<i64: 1, 1, 1, 128>}, {transform_indices = @transform_3, window_bounds = array<i64: 1, 8, 128>}]} {
    %c0_i32 = arith.constant 0 : i32
    %0 = arith.cmpi eq, %arg1, %c0_i32 : i32
    %1 = arith.extui %0 : i1 to i32
    %c0_i32_0 = arith.constant 0 : i32
    %2 = arith.cmpi ne, %1, %c0_i32_0 : i32
    scf.if %2 {
      %c0_14 = arith.constant 0 : index
      %c0_15 = arith.constant 0 : index
      %23 = vector.load %arg2[%c0_14, %c0_15] : memref<8x128xf32, #tpu.memory_space<vmem>>, vector<8x128xf32>
      %c0_16 = arith.constant 0 : index
      %c0_17 = arith.constant 0 : index
      %24 = vector.load %arg6[%c0_16, %c0_17] : memref<8x128xf32, #tpu.memory_space<vmem>>, vector<8x128xf32>
      tpu.vector_store %arg6[%c0_16, %c0_17], %23 {strides = array<i32>} : memref<8x128xf32, #tpu.memory_space<vmem>>, vector<8x128xf32>,
    } else {
    }
    %c0 = arith.constant 0 : index
    %c0_1 = arith.constant 0 : index
    %3 = vector.load %arg6[%c0, %c0_1] : memref<8x128xf32, #tpu.memory_space<vmem>>, vector<8x128xf32>
    %4 = arith.truncf %3 : vector<8x128xf32> to vector<8x128xbf16>
    %c0_2 = arith.constant 0 : index
    %c0_3 = arith.constant 0 : index
    %c0_4 = arith.constant 0 : index
    %c0_5 = arith.constant 0 : index
    %5 = vector.load %arg3[%c0_2, %c0_3, %c0_4, %c0_5] : memref<1x1x128x128xbf16, #tpu.memory_space<vmem>>, vector<1x1x128x128xbf16>
    %6 = vector.shape_cast %5 : vector<1x1x128x128xbf16> to vector<128x128xbf16>
    %cst = arith.constant dense<0.000000e+00> : vector<8x128xf32>
    %7 = tpu.matmul %4, %6, %cst {dimension_numbers = #tpu.dot_dimension_numbers<[1], [0], [0], [1], [0, 0, 1, 1], [], []>} : vector<8x128xbf16>, vector<128x128xbf16>, vector<8x128xf32> -> vector<8x128xf32>
    %c0_6 = arith.constant 0 : index
    %c0_7 = arith.constant 0 : index
    %c0_8 = arith.constant 0 : index
    %c0_9 = arith.constant 0 : index
    %8 = vector.load %arg4[%c0_6, %c0_7, %c0_8, %c0_9] : memref<1x1x1x128xf32, #tpu.memory_space<vmem>>, vector<1x1x1x128xf32>
    %9 = vector.shape_cast %8 : vector<1x1x1x128xf32> to vector<1x128xf32>
    %10 = vector.broadcast %9 : vector<1x128xf32> to vector<8x128xf32>
    %11 = arith.addf %7, %10 : vector<8x128xf32>
    %12 = arith.negf %11 : vector<8x128xf32>
    %13 = math.exp %12 : vector<8x128xf32>
    %cst_10 = arith.constant 1.000000e+00 : f32
    %14 = vector.broadcast %cst_10 : f32 to vector<8x128xf32>
    %15 = arith.addf %14, %13 : vector<8x128xf32>
    %16 = arith.divf %14, %15 : vector<8x128xf32>
    %17 = arith.mulf %11, %16 : vector<8x128xf32>
    %18 = arith.addf %3, %17 : vector<8x128xf32>
    %c0_11 = arith.constant 0 : index
    %c0_12 = arith.constant 0 : index
    %19 = vector.load %arg6[%c0_11, %c0_12] : memref<8x128xf32, #tpu.memory_space<vmem>>, vector<8x128xf32>
    tpu.vector_store %arg6[%c0_11, %c0_12], %18 {strides = array<i32>} : memref<8x128xf32, #tpu.memory_space<vmem>>, vector<8x128xf32>,
    %c1_i32 = arith.constant 1 : i32
    %20 = arith.cmpi eq, %arg1, %c1_i32 : i32
    %21 = arith.extui %20 : i1 to i32
    %c0_i32_13 = arith.constant 0 : i32
    %22 = arith.cmpi ne, %21, %c0_i32_13 : i32
    scf.if %22 {
      %c0_14 = arith.constant 0 : index
      %c0_15 = arith.constant 0 : index
      %c0_16 = arith.constant 0 : index
      %23 = vector.load %arg5[%c0_14, %c0_15, %c0_16] : memref<1x8x128xf32, #tpu.memory_space<vmem>>, vector<1x8x128xf32>
      %24 = vector.shape_cast %23 : vector<1x8x128xf32> to vector<8x128xf32>
      %25 = vector.shape_cast %18 : vector<8x128xf32> to vector<1x8x128xf32>
      tpu.vector_store %arg5[%c0_14, %c0_15, %c0_16], %25 {strides = array<i32>} : memref<1x8x128xf32, #tpu.memory_space<vmem>>, vector<1x8x128xf32>,
    } else {
    }
    return
  }
  func.func @transform_0(%arg0: i32, %arg1: i32) -> (i32, i32) {
    %c0_i32 = arith.constant 0 : i32
    %c0_i32_0 = arith.constant 0 : i32
    %c0_i32_1 = arith.constant 0 : i32
    return %c0_i32, %c0_i32_0 : i32, i32
  }
  func.func @transform_1(%arg0: i32, %arg1: i32) -> (i32, i32, i32, i32) {
    %c0_i32 = arith.constant 0 : i32
    %c0_i32_0 = arith.constant 0 : i32
    %c0_i32_1 = arith.constant 0 : i32
    return %arg0, %arg1, %c0_i32, %c0_i32_0 : i32, i32, i32, i32
  }
  func.func @transform_2(%arg0: i32, %arg1: i32) -> (i32, i32, i32, i32) {
    %c0_i32 = arith.constant 0 : i32
    %c0_i32_0 = arith.constant 0 : i32
    %c0_i32_1 = arith.constant 0 : i32
    return %arg0, %arg1, %c0_i32, %c0_i32_0 : i32, i32, i32, i32
  }
  func.func @transform_3(%arg0: i32, %arg1: i32) -> (i32, i32, i32) {
    %c0_i32 = arith.constant 0 : i32
    %c0_i32_0 = arith.constant 0 : i32
    %c0_i32_1 = arith.constant 0 : i32
    return %arg0, %c0_i32, %c0_i32_0 : i32, i32, i32
  }
}

</mosaic_0001>

<bundles_post_ra>
// kernel: tpu_custom_call.1
= control target key start
LH: loop header
LB: loop body
LE: loop exit
PB: predicated region body
PF: predicated region fallthrough
CT: control target
= control target key end

     0   :  { %s1211_s0 = inlined_call_operand.hbm [shape: f32[8,128], index: 0, kind: input, shape index: {}]   ;;  %s1212_s1 = inlined_call_operand.hbm [shape: bf16[2,2,128,128], index: 1, kind: input, shape index: {}]   ;;  %s1213_s2 = inlined_call_operand.hbm [shape: f32[2,2,1,128], index: 2, kind: input, shape index: {}]   ;;  %s1214_s3 = inlined_call_operand.hbm [shape: f32[2,8,128], index: 3, kind: output, shape index: {}]  }
   0x1   :  { %1223 = sst [smem:[#allocation17_spill]] %s1212_s1 }
   0x2   :  { %1224 = sst [smem:[#allocation18_spill]] %s1214_s3 }
   0x3   :  { %8 = vsyncpa [#allocation4], 0 }
   0x4   :  { %9 = vsyncpa [#allocation7], 0 }
   0x5   :  { %11 = vsyncpa [#allocation7 + $0x1], 0 }
   0x6   :  { %12 = vsyncpa [#allocation5], 0 }
   0x7   :  { %14 = vsyncpa [#allocation5 + $0x1], 0  ;;  %s946_s12 = smov 0   ;;  %s948_s13 = smov 0  }
   0x8   :  { %s950_s14 = smov 0   ;;  %s952_s15 = smov 0  }
   0x9   :  { %s954_s16 = smov 0   ;;  %s956_s17 = smov 0  }
   0xa   :  { %s958_s18 = smov 0   ;;  %s960_s19 = smov 0  }
   0xb   :  { %s962_s20 = smov 0   ;;  %s964_s21 = smov 0  }
   0xc   :  { %s966_s22 = smov 0  }
   0xd LB: > { %1225 = sst [smem:[#allocation13_spill]] %s904_s19  ;;  %s29_s23 = sadd.s32 1, %s908_s20  ;;  %s916_s22 = sphi %s966_s22, %s20_s22   ;;  %s912_s21 = sphi %s964_s21, %s1258_s21   ;;  %s908_s20 = sphi %s962_s20, %s1257_s20   ;;  %s904_s19 = sphi %s960_s19, %s1256_s19   ;;  %s900_s18 = sphi %s958_s18, %s1255_s18   ;;  %s896_s17 = sphi %s956_s17, %s1254_s17   ;;  %s892_s16 = sphi %s954_s16, %s1253_s16   ;;  %s888_s15 = sphi %s952_s15, %s1252_s15   ;;  %s884_s14 = sphi %s950_s14, %s1251_s14   ;;  %s880_s13 = sphi %s948_s13, %s1250_s13   ;;  %s876_s12 = sphi %s946_s12, %s1249_s12  }
   0xe   : > { %s32_s24 = sadd.s32 1, %s912_s21  ;;  %p30_p0 = scmp.ge.s32.totalorder %s29_s23, 2 }
   0xf   : > { %s62_s25 = sadd.s32 1, %s896_s17  ;;  %p69_p1 = scmp.ne.s32.totalorder %s896_s17, %s892_s16 }
  0x10   : > { %p70_p2 = scmp.eq.s32.totalorder %s916_s22, 0  ;;  %s1260_s23 = smov (%p30_p0, %s29_s23), 0 }
  0x11   : > { %1226 = sst [smem:[#allocation14_spill]] %s1260_s23  ;;  %s1262_s24 = smov (!%p30_p0, %s32_s24), %s912_s21 }
  0x12   : > { %s58_s26 = ssub.s32 %s908_s20, %s1260_s23  ;;  %p1012_p3 = por %p70_p2, %p69_p1 }
  0x13   : > { %p34_p4 = scmp.ge.s32.totalorder %s1262_s24, 2  ;;  %p602_p5 = scmp.lt.s32.totalorder %s916_s22, 4 }
  0x14   : > { %s164_s28 = sand.u32 1, %s916_s22   ;;  %s166_s29 = sand.u32 1, %s896_s17  }
  0x15   : > { %s1264_s24 = smov (%p34_p4, %s1262_s24), 0  ;;  %s521_s4 = sshll.u32 %s166_s29, 6 }
  0x16   : > { %1228 = sst [smem:[#allocation15_spill]] %s1264_s24  ;;  %s1023_s30 = ssub.s32 %s912_s21, %s1264_s24 }
  0x17   : > { %s59_s5 = sor.u32 %s58_s26, %s1023_s30  ;;  %s522_s6 = sshll.u32 %s908_s20, 4 }
  0x18   : > { %p60_p6 = scmp.eq.s32.totalorder %s59_s5, 0  ;;  %s523_s7 = sshll.u32 %s912_s21, 5 }
  0x19   : > { %s168_s8 = scalar_lea.vmem [#allocation6], %s521_s4  ;;  %s174_s11 = sadd.s32 %s523_s7, %s522_s6 }
  0x1a   : > { %s177_s9 = sshll.u32 %s168_s8, 4  ;;  %s524_s23 = sshll.u32 %s174_s11, 6  ;;  %s178_s9 = int_to_ptr.vmem [resolvable:$true] %s177_s9 }
  0x1b   : > { %s1031_s10 = scalar_select %p60_p6, %s896_s17, %s62_s25  }
  0x1c   : > { %p1037_p7 = pnand %p602_p5, %p1012_p3  ;;  %s1231_s1 = sld [smem:[#allocation17_spill]] }
  0x1d   : > { %1229 = sst [smem:[#allocation16_spill]] %s1031_s10  ;;  %s1044_s5 = scalar_lea.sflag [#allocation7], %s164_s28 }
  0x1e   : > { %p1218_p8 = pneg %p1037_p7  ;;  %s723_s25 = scalar_lea.vmem %s178_s9, 1024 }
  0x1f   : > { %p724_p9 = scmp.ne.s32.totalorder %s178_s9, %s723_s25  ;;  %s918_s27 = smov [#allocation6]  }
  0x20   : > { %s728_s4 = sshll.u32 %s918_s27, 4  ;;  %s729_s4 = int_to_ptr.vmem [resolvable:$false] %s728_s4 }
  0x21   : > { %p726_p10 = pnand %p724_p9, %p1218_p8  ;;  %s730_s6 = scalar_lea.vmem %s729_s4, 2048 }
  0x22   : > { %s176_s26 = scalar_lea.hbm %s1231_s1, %s524_s23  ;;  %p731_p12 = scmp.lt.s32.totalorder %s178_s9, %s729_s4 }
  0x23   : > { %p727_p11 = pneg %p726_p10  ;;  %p732_p13 = scmp.lt.s32.totalorder %s730_s6, %s723_s25 }
  0x25   : > { %p733_p0 = por %p732_p13, %p731_p12 }
  0x27   : > { %p734_p1 = pnand %p733_p0, %p727_p11 }
  0x29   : > { %737 = shalt.err (!%p734_p1)
}
  0x2a   : > { %s919_s19 = smov 64   ;;  %s920_s23 = smov 4  }
  0x2b   : > { %593 = dma.hbm_to_vmem [thread:$0]  (!%p1037_p7), %s176_s26, 1024, %s178_s9, %s1044_s5, %s919_s19, %s919_s19, %s920_s23  }
  0x2c   : > { %s1055_s24 = sadd.s32 4294967295, %s916_s22   ;;  %s517_s28 = sadd.s32 4294967294, %s916_s22  }
  0x2d   : > { %p75_p2 = scmp.ne.s32.totalorder %s892_s16, %s888_s15  ;;  %p1219_p3 = scmp.eq.s32.totalorder %s1055_s24, 0 }
  0x2e   : > { %p114_p4 = scmp.eq.s32.totalorder %s1023_s30, 0  ;;  %s116_s7 = sadd.s32 1, %s884_s14 }
  0x2f   : > { %p1065_p5 = por %p1219_p3, %p75_p2  ;;  %p126_p6 = scmp.ne.s32.totalorder %s884_s14, %s880_s13 }
  0x30   : > { %s1072_s11 = scalar_select %p114_p4, %s884_s14, %s116_s7  }
  0x31   : > { %s1232_s8 = scalar_select %p1065_p5, 1, 0 }
  0x32   : > { %p127_p9 = scmp.eq.s32.totalorder %s1055_s24, 3  ;;  %p132_p10 = scmp.ne.s32.totalorder %s880_s13, %s876_s12 }
  0x33   : > { %p133_p11 = scmp.eq.s32.totalorder %s517_s28, 3  ;;  %p518_p12 = scmp.ge.s32.totalorder %s916_s22, 1 }
  0x34   : > { %p1078_p13 = por %p127_p9, %p126_p6  ;;  %p140_p0 = scmp.lt.s32.totalorder %s916_s22, 5 }
  0x35   : > { %p1083_p1 = por %p133_p11, %p132_p10  ;;  %s921_s26 = smov [#allocation3]  }
  0x36   : > { %s1233_s15 = scalar_select %p1078_p13, 1, 0 }
  0x37   : > { %s1234_s30 = scalar_select %p1083_p1, 1, 0 }
  0x38   : > { %p1087_p2 = pnand %p518_p12, %p140_p0  ;;  %s153_s25 = sshll.u32 %s921_s26, 4  ;;  %s154_s25 = int_to_ptr.vmem [resolvable:$true] %s153_s25 }
  0x39   : > { %s525_s27 = sshll.u32 %s912_s21, 1  ;;  %s190_s4 = scalar_lea.vmem [#allocation8], %s166_s29 }
  0x3a   : > { %s1235_s9 = scalar_select %p1087_p2, 1, 0 }
  0x3b   : > { %p586_p4 = pneg %p1087_p2  ;;  %s199_s6 = sshll.u32 %s190_s4, 4  ;;  %s200_s6 = int_to_ptr.vmem [resolvable:$true] %s199_s6 }
  0x3c   : > { %s195_s23 = sadd.s32 %s908_s20, %s525_s27  ;;  %s749_s10 = scalar_lea.vmem %s154_s25, 128 }
  0x3d   : > { %p1098_p6 = pnand %p586_p4, %p1219_p3  ;;  %s526_s28 = sshll.u32 %s195_s23, 4 }
  0x3e   : > { %s197_s26 = scalar_lea.hbm %s1213_s2, %s526_s28  ;;  %p750_p10 = scmp.ne.s32.totalorder %s154_s25, %s749_s10 }
  0x3f   : > { %p740_p9 = pneg %p1098_p6  ;;  %p757_p0 = scmp.lt.s32.totalorder %s154_s25, %s154_s25 }
  0x40   : > { %p758_p8 = scmp.lt.s32.totalorder %s749_s10, %s749_s10 }
  0x41   : > { %p752_p11 = pnand %p750_p10, %p740_p9 }
  0x42   : > { %p759_p4 = por %p758_p8, %p757_p0 }
  0x43   : > { %p753_p12 = pneg %p752_p11 }
  0x45   : > { %p760_p3 = pnand %p759_p4, %p753_p12 }
  0x47   : > { %763 = shalt.err (!%p760_p3)
}
  0x48   : > { %589 = dma.hbm_to_vmem [thread:$0]  (!%p1098_p6), %s1211_s0, 128, %s154_s25, [#allocation4]  }
  0x49   : > { %s777_s1 = scalar_lea.vmem %s200_s6, 16  ;;  %p1237_p13 = pneg %p1037_p7 }
  0x4a   : > { %p778_p1 = scmp.ne.s32.totalorder %s200_s6, %s777_s1  ;;  %s922_s4 = smov [#allocation8]  }
  0x4b   : > { %s782_s23 = sshll.u32 %s922_s4, 4  ;;  %s783_s23 = int_to_ptr.vmem [resolvable:$false] %s782_s23 }
  0x4c   : > { %p780_p5 = pnand %p778_p1, %p1237_p13  ;;  %s784_s10 = scalar_lea.vmem %s783_s23, 32 }
  0x4d   : > { %p785_p8 = scmp.lt.s32.totalorder %s200_s6, %s783_s23  ;;  %p786_p9 = scmp.lt.s32.totalorder %s784_s10, %s777_s1 }
  0x4e   : > { %p781_p2 = pneg %p780_p5 }
  0x4f   : > { %p787_p3 = por %p786_p9, %p785_p8 }
  0x51   : > { %p788_p10 = pnand %p787_p3, %p781_p2 }
  0x53   : > { %791 = shalt.err (!%p788_p10)
}
  0x54   : > { %596 = dma.hbm_to_vmem [thread:$0]  (!%p1037_p7), %s197_s26, 16, %s200_s6, %s1044_s5  }
  0x55   : > { %p1238_p6 = scmp.ne.s32.totalorder %s1235_s9, 0 }
  0x56   : > { %p1239_p11 = scmp.eq.s32.totalorder (!%p1238_p6), %s1055_s24, 0 }
  0x57   : > { %208 = sbr.rel (%p1238_p6) target bundleno = 400 (0x190), region = 32 }
  0x5c   : > { %863 = dma.done.wait (%p1239_p11), [#allocation4], 128   ;;  %p1240_p5 = pmov %p1239_p11 }
  0x5d   : > { %s214_s25 = sand.u32 1, %s1055_s24   ;;  %s216_s19 = sand.u32 1, %s892_s16  }
  0x5e   : > { %865 = vsyncadd (%p1240_p5), [#allocation4], 4294967168  ;;  %s529_s28 = sshll.u32 %s216_s19, 6  ;;  %s215_s7 = scalar_lea.sflag [#allocation7], %s214_s25 }
  0x5f   : > { %s1127_s29 = scalar_lea.vmem [#allocation6], %s529_s28  ;;  %p1241_p13 = scmp.ne.s32.totalorder %s1232_s8, 0 }
  0x61   : > { %867 = dma.done.wait (%p1241_p13), %s215_s7, 1040  }
  0x62   : > { %869 = vsyncadd (%p1241_p13), %s215_s7, 4294966256  ;;  %s250_s3 = sand.u32 1, %s880_s13   ;;  %s1138_s9 = scalar_lea.vmem [#allocation8], %s216_s19 }
  0x63   : > { %s1136_s5 = sshll.u32 %s250_s3, 3  ;;  %p531_p7 = scmp.ne.s32.totalorder %s900_s18, 0 }
  0x64   : > { %s252_s24 = scalar_lea.vmem [#allocation9], %s1136_s5 }
  0x65   : > { %257 = sbr.rel (%p531_p7) target bundleno = 108 (0x6c), region = 48 }
  0x6a   : > { %v258_v0 = vld [vmem:[#allocation3] sm:$0xff] }
  0x6b   : > { %259 = vst [vmem:[#allocation2] sm:$0xff] %v258_v0 }
  0x6c PF: > { %v698_v1 = vld [vmem:[%s1127_s29 + $0x38] sm:$0xff]   ;;  %v923_v2 = vmov 0.0   ;;  %v699_v3 = vld [vmem:[%s1127_s29 + $0x30] sm:$0xff]   ;;  %vm924_vm0 = vmmov 0   ;;  %v700_v4 = vld [vmem:[%s1127_s29 + $0x28] sm:$0xff]   ;;  %p542_p1 = scmp.ne.s32.totalorder %s900_s18, 1 }
  0x6d   : > { %556 = vmatprep.subr.bf16.mxu0 %v923_v2  ;;  %572 = vmatprep.mubr.msk.bf16.mxu0 %vm924_vm0, %v923_v2  ;;  %v701_v5 = vld [vmem:[%s1127_s29 + $0x20] sm:$0xff]   ;;  %v702_v6 = vld [vmem:[%s1127_s29 + $0x18] sm:$0xff]   ;;  %v703_v7 = vld [vmem:[%s1127_s29 + $0x10] sm:$0xff]  }
  0x6e   : > { %557 = vmatpush3.bf16.msra.mxu0 %v698_v1  ;;  %v704_v8 = vld [vmem:[%s1127_s29 + $0x8] sm:$0xff]   ;;  %v705_v9 = vld [vmem:[%s1127_s29] sm:$0xff]   ;;  %v532_v12 = vld [vmem:[%s1138_s9] ss:$0 sm:$0xff] }
  0x6f   : > { %558 = vmatprep.subr.bf16.mxu0 %v923_v2 }
  0x72   : > { %559 = vmatpush3.bf16.msra.mxu0 %v699_v3  ;;  %v260_v10 = vld [vmem:[#allocation2] sm:$0xff] }
  0x73   : > { %560 = vmatprep.subr.bf16.mxu0 %v923_v2  ;;  %v261_v11 = vpack.c.bf16 %v260_v10, %v260_v10 }
  0x76   : > { %561 = vmatpush3.bf16.msra.mxu0 %v700_v4 }
  0x77   : > { %562 = vmatprep.subr.bf16.mxu0 %v923_v2 }
  0x7a   : > { %563 = vmatpush3.bf16.msra.mxu0 %v701_v5 }
  0x7b   : > { %564 = vmatprep.subr.bf16.mxu0 %v923_v2 }
  0x7e   : > { %565 = vmatpush3.bf16.msra.mxu0 %v702_v6 }
  0x7f   : > { %566 = vmatprep.subr.bf16.mxu0 %v923_v2 }
  0x82   : > { %567 = vmatpush3.bf16.msra.mxu0 %v703_v7 }
  0x83   : > { %568 = vmatprep.subr.bf16.mxu0 %v923_v2 }
  0x86   : > { %569 = vmatpush3.bf16.msra.mxu0 %v704_v8 }
  0x87   : > { %570 = vmatprep.subr.bf16.mxu0 %v923_v2 }
  0x8a   : > { %571 = vmatpush3.bf16.msra.mxu0 %v705_v9 }
  0x8d   : > { %573 = vmatmul.mubr.bf16.vlgmr.msra.gmra.mxu0 %v261_v11 }
 0x14d   : > { %v367_v13 = vpop.f32.mrf.mxu0 }
 0x14e   : > { %v368_v14 = vadd.f32 %v532_v12, %v367_v13 }
 0x14f   : > { %v574_v15 = vpop.f32.mrf.mxu0 }
 0x150   : > { %v541_v16 = vmul.f32 -1.442695, %v368_v14 }
 0x151   : > { %v370_v17 = vpop.f32.mrf.mxu0 }
 0x152   : > { %706 = vpow2.f32 %v541_v16 }
 0x153   : > { %v575_v18 = vpop.f32.mrf.mxu0 }
 0x15f   : > { %v707_v19 = vpop.eup %706 }
 0x160   : > { %v376_v20 = vadd.f32 1.0, %v707_v19 }
 0x162   : > { %708 = vrcp.f32 %v376_v20 }
 0x16f   : > { %v709_v21 = vpop.eup %708 }
 0x170   : > { %v379_v22 = vmul.f32 %v709_v21, %v368_v14  ;;  %385 = sbr.rel (%p542_p1) target bundleno = 374 (0x176), region = 52 }
 0x172   : > { %v380_v23 = vadd.f32 %v379_v22, %v260_v10 }
 0x174   : > { %381 = vst [vmem:[#allocation2] sm:$0xff] %v380_v23 }
 0x175   : > { %386 = vst [vmem:[%s252_s24] sm:$0xff] %v380_v23 }
 0x176 PF: > { %s1242_s8 = sld [smem:[#allocation13_spill]]  ;;  %s401_s23 = sshll.u32 %s252_s24, 4  ;;  %s402_s23 = int_to_ptr.vmem [resolvable:$true] %s401_s23 }
 0x177   : > { %s1243_s1 = sld [smem:[#allocation18_spill]]  ;;  %s388_s10 = scalar_lea.sflag [#allocation5], %s250_s3 }
 0x178   : > { %s792_s18 = scalar_lea.vmem %s402_s23, 128  ;;  %p1244_p12 = scmp.ne.s32.totalorder %s1233_s15, 0 }
 0x179   : > { %p793_p2 = scmp.ne.s32.totalorder %s402_s23, %s792_s18  ;;  %s925_s25 = smov [#allocation9]  }
 0x17a   : > { %s796_s19 = sshll.u32 %s925_s25, 4  ;;  %s797_s19 = int_to_ptr.vmem [resolvable:$false] %s796_s19 }
 0x17b   : > { %p794_p0 = pnand %p793_p2, %p1244_p12  ;;  %s798_s28 = scalar_lea.vmem %s797_s19, 256 }
 0x17c   : > { %s544_s6 = sshll.u32 %s1242_s8, 7  ;;  %p799_p8 = scmp.lt.s32.totalorder %s402_s23, %s797_s19 }
 0x17d   : > { %s399_s4 = scalar_lea.hbm %s1243_s1, %s544_s6  ;;  %p795_p4 = pneg %p794_p0 }
 0x17e   : > { %p800_p9 = scmp.lt.s32.totalorder %s798_s28, %s792_s18 }
 0x180   : > { %p801_p3 = por %p800_p9, %p799_p8 }
 0x182   : > { %p802_p10 = pnand %p801_p3, %p795_p4 }
 0x184   : > { %805 = shalt.err (!%p802_p10)
}
 0x185   : > { %s806_s7 = scalar_lea.hbm %s399_s4, 128  ;;  %s810_s5 = scalar_lea.hbm %s1243_s1, 256 }
 0x186   : > { %p807_p6 = scmp.ne.s32.totalorder %s399_s4, %s806_s7  ;;  %p811_p13 = scmp.lt.s32.totalorder %s399_s4, %s1243_s1 }
 0x187   : > { %p812_p7 = scmp.lt.s32.totalorder %s810_s5, %s806_s7 }
 0x188   : > { %p808_p11 = pnand %p807_p6, %p1244_p12 }
 0x189   : > { %p813_p1 = por %p812_p7, %p811_p13 }
 0x18a   : > { %p809_p5 = pneg %p808_p11 }
 0x18c   : > { %p814_p2 = pnand %p813_p1, %p809_p5 }
 0x18e   : > { %817 = shalt.err (!%p814_p2)
}
 0x18f   : > { %584 = dma.vmem_to_hbm [thread:$0]  (%p1244_p12), %s402_s23, 128, %s399_s4, %s388_s10  }
 0x190 PF: > { %p604_p0 = scmp.ge.s32.totalorder %s916_s22, 2  ;;  %s413_s8 = sand.u32 1, %s876_s12  }
 0x191   : > { %p1245_p4 = scmp.ne.s32.totalorder %s1234_s30, 0  ;;  %s414_s6 = scalar_lea.sflag [#allocation5], %s413_s8 }
 0x193   : > { %p598_p8 = pnand %p604_p0, %p1245_p4 }
 0x195   : > { %p599_p9 = pneg %p598_p8 }
 0x197   : > { %871 = dma.done.wait (%p599_p9), %s414_s6, 128  }
 0x198   : > { %873 = vsyncadd (%p599_p9), %s414_s6, 4294967168  ;;  %s20_s22 = sadd.s32 1, %s916_s22   ;;  %s1246_s26 = sld [smem:[#allocation16_spill]] }
 0x199   : > { %p17_p3 = scmp.ge.s32.totalorder %s20_s22, 6   ;;  %s1247_s27 = sld [smem:[#allocation14_spill]] }
 0x19a   : > { %s1248_s4 = sld [smem:[#allocation15_spill]]  ;;  %s1249_s12 = smov %s880_s13 }
 0x19b   : > { %s1250_s13 = smov %s884_s14  ;;  %s1251_s14 = smov %s1072_s11 }
 0x19c   : > { %s1252_s15 = smov %s892_s16  ;;  %s1253_s16 = smov %s896_s17 }
 0x19d   : > { %s1255_s18 = smov %s908_s20  ;;  %s1256_s19 = smov %s912_s21 }
 0x19e   : > { %s1254_s17 = smov %s1246_s26  ;;  %19 = sbr.rel (!%p17_p3) target bundleno = 13 (0xd), region = 101 }
 0x19f   : > { %s1257_s20 = smov %s1247_s27 }
 0x1a0   : > { %s1258_s21 = smov %s1248_s4 }
 0x1a3   :  { %419 = vsyncpa [#allocation4], 1 }
 0x1a4   :  { %421 = vsyncpa [#allocation4 + $0x1], 1 }
 0x1a5   :  { %422 = vsyncpa [#allocation7], 1 }
 0x1a6   :  { %424 = vsyncpa [#allocation7 + $0x1], 1 }
 0x1a7   :  { %425 = vsyncpa [#allocation5], 1 }
 0x1a8   :  { %427 = vsyncpa [#allocation5 + $0x1], 1 }

</bundles_post_ra>
